<compile_context>
chip_gen: v5e
topology: v5e:2x2
jax: 0.10.0
libtpu: 0.0.40
codegen_flags: <defaults>
</compile_context>

<pallas_src>
import jax
import jax.numpy as jnp
from jax.experimental import pallas as pl
from jax.experimental.pallas import tpu as pltpu


def _round_up(n, m):
    return ((n + m - 1) // m) * m


def _mlp_base_kernel(x_ref,
                     w1c_ref, b1c_ref, w2c_ref, b2c_ref,
                     w1a_ref, b1a_ref, w2a_ref, b2a_ref,
                     wcl_ref, bcl_ref,
                     val_ref, actor_ref):
    x = x_ref[...].astype(jnp.float32)

    # Critic trunk: Linear -> Tanh -> Linear -> Tanh
    hc = jnp.tanh(
        jnp.dot(x, w1c_ref[...], preferred_element_type=jnp.float32) + b1c_ref[...])
    hc = jnp.tanh(
        jnp.dot(hc, w2c_ref[...], preferred_element_type=jnp.float32) + b2c_ref[...])

    # Actor trunk: Linear -> Tanh -> Linear -> Tanh
    ha = jnp.tanh(
        jnp.dot(x, w1a_ref[...], preferred_element_type=jnp.float32) + b1a_ref[...])
    ha = jnp.tanh(
        jnp.dot(ha, w2a_ref[...], preferred_element_type=jnp.float32) + b2a_ref[...])

    # critic_linear: hidden -> 1
    val = jnp.dot(hc, wcl_ref[...], preferred_element_type=jnp.float32) + bcl_ref[...]

    val_ref[...] = val.astype(val_ref.dtype)
    actor_ref[...] = ha.astype(actor_ref.dtype)


def mlp_base_forward(inputs, masks, params, *, block_rows=512,
                     vmem_limit_bytes=32 * 1024 * 1024):
    """Fused MLPBase forward. Returns (value (N,1), hidden_actor (N,H))."""
    del masks  # unused by MLPBase.forward (matches the PyTorch reference)

    x = inputs
    N, D = x.shape
    H = params["w1c"].shape[1]
    dtype = x.dtype
    itemsize = jnp.dtype(dtype).itemsize

    # Row tile: as large as possible while keeping the double-buffered
    # (x tile + both output tiles) well inside the scoped-VMEM budget
    # (~1/4 of the limit; weights / f32 activations use the rest).
    bytes_per_row = (D + H + 1) * itemsize
    budget = vmem_limit_bytes // 4
    max_rows = max(8, (budget // (2 * bytes_per_row)) // 8 * 8)
    tr = min(block_rows, max_rows, _round_up(N, 8))
    tr = max(8, (tr // 8) * 8)

    rp = _round_up(N, tr)
    x_p = x if rp == N else jnp.pad(x, ((0, rp - N), (0, 0)))
    grid = (rp // tr,)

    def row_spec(shape):
        return pl.BlockSpec(shape, lambda i: (i, 0))

    def const_spec(shape):
        return pl.BlockSpec(shape, lambda i: (0, 0))

    value_p, actor_p = pl.pallas_call(
        _mlp_base_kernel,
        out_shape=(jax.ShapeDtypeStruct((rp, 1), dtype),
                   jax.ShapeDtypeStruct((rp, H), dtype)),
        grid_spec=pltpu.PrefetchScalarGridSpec(
            num_scalar_prefetch=0,
            grid=grid,
            in_specs=[
                row_spec((tr, D)),
                const_spec(params["w1c"].shape), const_spec(params["b1c"].shape),
                const_spec(params["w2c"].shape), const_spec(params["b2c"].shape),
                const_spec(params["w1a"].shape), const_spec(params["b1a"].shape),
                const_spec(params["w2a"].shape), const_spec(params["b2a"].shape),
                const_spec(params["wcl"].shape), const_spec(params["bcl"].shape),
            ],
            out_specs=[row_spec((tr, 1)), row_spec((tr, H))],
        ),
        compiler_params=pltpu.CompilerParams(
            dimension_semantics=("parallel",),
            vmem_limit_bytes=vmem_limit_bytes,
        ),
    )(x_p,
      params["w1c"], params["b1c"], params["w2c"], params["b2c"],
      params["w1a"], params["b1a"], params["w2a"], params["b2a"],
      params["wcl"], params["bcl"])

    return value_p[:N], actor_p[:N]


if __name__ == "__main__":
    key = jax.random.PRNGKey(0)
    ks = jax.random.split(key, 12)

    input_d, hidden = 32, 64

    def lin(kw, kb, fan_in, fan_out):
        # Deterministic stand-in for the orthogonal/zero init (init is
        # host-side and does not affect forward semantics).
        w = jax.random.normal(kw, (fan_in, fan_out), jnp.float32) / jnp.sqrt(
            jnp.float32(fan_in))
        b = jax.random.normal(kb, (1, fan_out), jnp.float32) * 0.1
        return w, b

    w1c, b1c = lin(ks[0], ks[1], input_d, hidden)
    w2c, b2c = lin(ks[2], ks[3], hidden, hidden)
    w1a, b1a = lin(ks[4], ks[5], input_d, hidden)
    w2a, b2a = lin(ks[6], ks[7], hidden, hidden)
    wcl, bcl = lin(ks[8], ks[9], hidden, 1)

    params = dict(w1c=w1c, b1c=b1c, w2c=w2c, b2c=b2c,
                  w1a=w1a, b1a=b1a, w2a=w2a, b2a=b2a,
                  wcl=wcl, bcl=bcl)

    hp = jax.lax.Precision.HIGHEST

    def ref_forward(x):
        hc = jnp.tanh(jnp.dot(x, w1c, precision=hp) + b1c)
        hc = jnp.tanh(jnp.dot(hc, w2c, precision=hp) + b2c)
        ha = jnp.tanh(jnp.dot(x, w1a, precision=hp) + b1a)
        ha = jnp.tanh(jnp.dot(ha, w2a, precision=hp) + b2a)
        return jnp.dot(hc, wcl, precision=hp) + bcl, ha

    # Small batch (exercises row padding up to the 8-sublane tile).
    x_small = jax.random.normal(ks[10], (2, input_d), jnp.float32)
    masks_small = jnp.ones((2, 1), jnp.float32)  # unused, kept for API parity
    v, a = mlp_base_forward(x_small, masks_small, params)
    v, a = jax.block_until_ready((v, a))
    v_ref, a_ref = ref_forward(x_small)
    assert v.shape == (2, 1) and a.shape == (2, hidden)
    assert jnp.allclose(v, v_ref, atol=1e-4), "value mismatch (small batch)"
    assert jnp.allclose(a, a_ref, atol=1e-4), "actor mismatch (small batch)"

    # Larger, non-multiple batch (exercises the multi-tile pipelined grid).
    x_big = jax.random.normal(ks[11], (300, input_d), jnp.float32)
    masks_big = jnp.ones((300, 1), jnp.float32)
    vb, ab = mlp_base_forward(x_big, masks_big, params, block_rows=128)
    vb, ab = jax.block_until_ready((vb, ab))
    vb_ref, ab_ref = ref_forward(x_big)
    assert jnp.allclose(vb, vb_ref, atol=1e-4), "value mismatch (large batch)"
    assert jnp.allclose(ab, ab_ref, atol=1e-4), "actor mismatch (large batch)"

    print("KERNEL_OK")
</pallas_src>

<mosaic_0001>
module attributes {stable_mosaic.version = 11 : i64} {
  func.func @_mlp_base_kernel(%arg0: i32, %arg1: memref<8x32xf32, #tpu.memory_space<vmem>>, %arg2: memref<32x64xf32, #tpu.memory_space<vmem>>, %arg3: memref<1x64xf32, #tpu.memory_space<vmem>>, %arg4: memref<64x64xf32, #tpu.memory_space<vmem>>, %arg5: memref<1x64xf32, #tpu.memory_space<vmem>>, %arg6: memref<32x64xf32, #tpu.memory_space<vmem>>, %arg7: memref<1x64xf32, #tpu.memory_space<vmem>>, %arg8: memref<64x64xf32, #tpu.memory_space<vmem>>, %arg9: memref<1x64xf32, #tpu.memory_space<vmem>>, %arg10: memref<64x1xf32, #tpu.memory_space<vmem>>, %arg11: memref<1x1xf32, #tpu.memory_space<vmem>>, %arg12: memref<8x1xf32, #tpu.memory_space<vmem>>, %arg13: memref<8x64xf32, #tpu.memory_space<vmem>>) attributes {dimension_semantics = [#tpu.dimension_semantics<parallel>], iteration_bounds = array<i64: 1>, scalar_prefetch = 0 : i64, scratch_operands = 0 : i64, tpu.core_type = #tpu.core_type<tc>, window_params = [{transform_indices = @transform_0, window_bounds = array<i64: 8, 32>}, {pipeline_mode = #tpu.pipeline_mode<synchronous>, transform_indices = @transform_1, window_bounds = array<i64: 32, 64>}, {pipeline_mode = #tpu.pipeline_mode<synchronous>, transform_indices = @transform_2, window_bounds = array<i64: 1, 64>}, {pipeline_mode = #tpu.pipeline_mode<synchronous>, transform_indices = @transform_3, window_bounds = array<i64: 64, 64>}, {pipeline_mode = #tpu.pipeline_mode<synchronous>, transform_indices = @transform_4, window_bounds = array<i64: 1, 64>}, {pipeline_mode = #tpu.pipeline_mode<synchronous>, transform_indices = @transform_5, window_bounds = array<i64: 32, 64>}, {pipeline_mode = #tpu.pipeline_mode<synchronous>, transform_indices = @transform_6, window_bounds = array<i64: 1, 64>}, {pipeline_mode = #tpu.pipeline_mode<synchronous>, transform_indices = @transform_7, window_bounds = array<i64: 64, 64>}, {pipeline_mode = #tpu.pipeline_mode<synchronous>, transform_indices = @transform_8, window_bounds = array<i64: 1, 64>}, {pipeline_mode = #tpu.pipeline_mode<synchronous>, transform_indices = @transform_9, window_bounds = array<i64: 64, 1>}, {pipeline_mode = #tpu.pipeline_mode<synchronous>, transform_indices = @transform_10, window_bounds = array<i64: 1, 1>}, {transform_indices = @transform_11, window_bounds = array<i64: 8, 1>}, {transform_indices = @transform_12, window_bounds = array<i64: 8, 64>}]} {
    %c0 = arith.constant 0 : index
    %c0_0 = arith.constant 0 : index
    %0 = vector.load %arg1[%c0, %c0_0] : memref<8x32xf32, #tpu.memory_space<vmem>>, vector<8x32xf32>
    %c0_1 = arith.constant 0 : index
    %c0_2 = arith.constant 0 : index
    %1 = vector.load %arg2[%c0_1, %c0_2] : memref<32x64xf32, #tpu.memory_space<vmem>>, vector<32x64xf32>
    %cst = arith.constant dense<0.000000e+00> : vector<8x64xf32>
    %2 = tpu.matmul %0, %1, %cst {dimension_numbers = #tpu.dot_dimension_numbers<[1], [0], [0], [1], [0, 0, 1, 1], [], []>} : vector<8x32xf32>, vector<32x64xf32>, vector<8x64xf32> -> vector<8x64xf32>
    %c0_3 = arith.constant 0 : index
    %c0_4 = arith.constant 0 : index
    %3 = vector.load %arg3[%c0_3, %c0_4] : memref<1x64xf32, #tpu.memory_space<vmem>>, vector<1x64xf32>
    %4 = vector.broadcast %3 : vector<1x64xf32> to vector<8x64xf32>
    %5 = arith.addf %2, %4 : vector<8x64xf32>
    %6 = math.tanh %5 : vector<8x64xf32>
    %c0_5 = arith.constant 0 : index
    %c0_6 = arith.constant 0 : index
    %7 = vector.load %arg4[%c0_5, %c0_6] : memref<64x64xf32, #tpu.memory_space<vmem>>, vector<64x64xf32>
    %cst_7 = arith.constant dense<0.000000e+00> : vector<8x64xf32>
    %8 = tpu.matmul %6, %7, %cst_7 {dimension_numbers = #tpu.dot_dimension_numbers<[1], [0], [0], [1], [0, 0, 1, 1], [], []>} : vector<8x64xf32>, vector<64x64xf32>, vector<8x64xf32> -> vector<8x64xf32>
    %c0_8 = arith.constant 0 : index
    %c0_9 = arith.constant 0 : index
    %9 = vector.load %arg5[%c0_8, %c0_9] : memref<1x64xf32, #tpu.memory_space<vmem>>, vector<1x64xf32>
    %10 = vector.broadcast %9 : vector<1x64xf32> to vector<8x64xf32>
    %11 = arith.addf %8, %10 : vector<8x64xf32>
    %12 = math.tanh %11 : vector<8x64xf32>
    %c0_10 = arith.constant 0 : index
    %c0_11 = arith.constant 0 : index
    %13 = vector.load %arg6[%c0_10, %c0_11] : memref<32x64xf32, #tpu.memory_space<vmem>>, vector<32x64xf32>
    %cst_12 = arith.constant dense<0.000000e+00> : vector<8x64xf32>
    %14 = tpu.matmul %0, %13, %cst_12 {dimension_numbers = #tpu.dot_dimension_numbers<[1], [0], [0], [1], [0, 0, 1, 1], [], []>} : vector<8x32xf32>, vector<32x64xf32>, vector<8x64xf32> -> vector<8x64xf32>
    %c0_13 = arith.constant 0 : index
    %c0_14 = arith.constant 0 : index
    %15 = vector.load %arg7[%c0_13, %c0_14] : memref<1x64xf32, #tpu.memory_space<vmem>>, vector<1x64xf32>
    %16 = vector.broadcast %15 : vector<1x64xf32> to vector<8x64xf32>
    %17 = arith.addf %14, %16 : vector<8x64xf32>
    %18 = math.tanh %17 : vector<8x64xf32>
    %c0_15 = arith.constant 0 : index
    %c0_16 = arith.constant 0 : index
    %19 = vector.load %arg8[%c0_15, %c0_16] : memref<64x64xf32, #tpu.memory_space<vmem>>, vector<64x64xf32>
    %cst_17 = arith.constant dense<0.000000e+00> : vector<8x64xf32>
    %20 = tpu.matmul %18, %19, %cst_17 {dimension_numbers = #tpu.dot_dimension_numbers<[1], [0], [0], [1], [0, 0, 1, 1], [], []>} : vector<8x64xf32>, vector<64x64xf32>, vector<8x64xf32> -> vector<8x64xf32>
    %c0_18 = arith.constant 0 : index
    %c0_19 = arith.constant 0 : index
    %21 = vector.load %arg9[%c0_18, %c0_19] : memref<1x64xf32, #tpu.memory_space<vmem>>, vector<1x64xf32>
    %22 = vector.broadcast %21 : vector<1x64xf32> to vector<8x64xf32>
    %23 = arith.addf %20, %22 : vector<8x64xf32>
    %24 = math.tanh %23 : vector<8x64xf32>
    %c0_20 = arith.constant 0 : index
    %c0_21 = arith.constant 0 : index
    %25 = vector.load %arg10[%c0_20, %c0_21] : memref<64x1xf32, #tpu.memory_space<vmem>>, vector<64x1xf32>
    %cst_22 = arith.constant dense<0.000000e+00> : vector<8x1xf32>
    %26 = tpu.matmul %12, %25, %cst_22 {dimension_numbers = #tpu.dot_dimension_numbers<[1], [0], [0], [1], [0, 0, 1, 1], [], []>} : vector<8x64xf32>, vector<64x1xf32>, vector<8x1xf32> -> vector<8x1xf32>
    %c0_23 = arith.constant 0 : index
    %c0_24 = arith.constant 0 : index
    %27 = vector.load %arg11[%c0_23, %c0_24] : memref<1x1xf32, #tpu.memory_space<vmem>>, vector<1x1xf32>
    %28 = vector.broadcast %27 : vector<1x1xf32> to vector<8x1xf32>
    %29 = arith.addf %26, %28 : vector<8x1xf32>
    %c0_25 = arith.constant 0 : index
    %c0_26 = arith.constant 0 : index
    %30 = vector.load %arg12[%c0_25, %c0_26] : memref<8x1xf32, #tpu.memory_space<vmem>>, vector<8x1xf32>
    tpu.vector_store %arg12[%c0_25, %c0_26], %29 {strides = array<i32>} : memref<8x1xf32, #tpu.memory_space<vmem>>, vector<8x1xf32>,
    %c0_27 = arith.constant 0 : index
    %c0_28 = arith.constant 0 : index
    %31 = vector.load %arg13[%c0_27, %c0_28] : memref<8x64xf32, #tpu.memory_space<vmem>>, vector<8x64xf32>
    tpu.vector_store %arg13[%c0_27, %c0_28], %24 {strides = array<i32>} : memref<8x64xf32, #tpu.memory_space<vmem>>, vector<8x64xf32>,
    return
  }
  func.func @transform_0(%arg0: i32) -> (i32, i32) {
    %c0_i32 = arith.constant 0 : i32
    %c0_i32_0 = arith.constant 0 : i32
    return %arg0, %c0_i32 : i32, i32
  }
  func.func @transform_1(%arg0: i32) -> (i32, i32) {
    %c0_i32 = arith.constant 0 : i32
    %c0_i32_0 = arith.constant 0 : i32
    %c0_i32_1 = arith.constant 0 : i32
    return %c0_i32, %c0_i32_0 : i32, i32
  }
  func.func @transform_2(%arg0: i32) -> (i32, i32) {
    %c0_i32 = arith.constant 0 : i32
    %c0_i32_0 = arith.constant 0 : i32
    %c0_i32_1 = arith.constant 0 : i32
    return %c0_i32, %c0_i32_0 : i32, i32
  }
  func.func @transform_3(%arg0: i32) -> (i32, i32) {
    %c0_i32 = arith.constant 0 : i32
    %c0_i32_0 = arith.constant 0 : i32
    %c0_i32_1 = arith.constant 0 : i32
    return %c0_i32, %c0_i32_0 : i32, i32
  }
  func.func @transform_4(%arg0: i32) -> (i32, i32) {
    %c0_i32 = arith.constant 0 : i32
    %c0_i32_0 = arith.constant 0 : i32
    %c0_i32_1 = arith.constant 0 : i32
    return %c0_i32, %c0_i32_0 : i32, i32
  }
  func.func @transform_5(%arg0: i32) -> (i32, i32) {
    %c0_i32 = arith.constant 0 : i32
    %c0_i32_0 = arith.constant 0 : i32
    %c0_i32_1 = arith.constant 0 : i32
    return %c0_i32, %c0_i32_0 : i32, i32
  }
  func.func @transform_6(%arg0: i32) -> (i32, i32) {
    %c0_i32 = arith.constant 0 : i32
    %c0_i32_0 = arith.constant 0 : i32
    %c0_i32_1 = arith.constant 0 : i32
    return %c0_i32, %c0_i32_0 : i32, i32
  }
  func.func @transform_7(%arg0: i32) -> (i32, i32) {
    %c0_i32 = arith.constant 0 : i32
    %c0_i32_0 = arith.constant 0 : i32
    %c0_i32_1 = arith.constant 0 : i32
    return %c0_i32, %c0_i32_0 : i32, i32
  }
  func.func @transform_8(%arg0: i32) -> (i32, i32) {
    %c0_i32 = arith.constant 0 : i32
    %c0_i32_0 = arith.constant 0 : i32
    %c0_i32_1 = arith.constant 0 : i32
    return %c0_i32, %c0_i32_0 : i32, i32
  }
  func.func @transform_9(%arg0: i32) -> (i32, i32) {
    %c0_i32 = arith.constant 0 : i32
    %c0_i32_0 = arith.constant 0 : i32
    %c0_i32_1 = arith.constant 0 : i32
    return %c0_i32, %c0_i32_0 : i32, i32
  }
  func.func @transform_10(%arg0: i32) -> (i32, i32) {
    %c0_i32 = arith.constant 0 : i32
    %c0_i32_0 = arith.constant 0 : i32
    %c0_i32_1 = arith.constant 0 : i32
    return %c0_i32, %c0_i32_0 : i32, i32
  }
  func.func @transform_11(%arg0: i32) -> (i32, i32) {
    %c0_i32 = arith.constant 0 : i32
    %c0_i32_0 = arith.constant 0 : i32
    return %arg0, %c0_i32 : i32, i32
  }
  func.func @transform_12(%arg0: i32) -> (i32, i32) {
    %c0_i32 = arith.constant 0 : i32
    %c0_i32_0 = arith.constant 0 : i32
    return %arg0, %c0_i32 : i32, i32
  }
}

</mosaic_0001>

<bundles_post_ra>
// kernel: tpu_custom_call.1
= control target key start
LH: loop header
LB: loop body
LE: loop exit
PB: predicated region body
PF: predicated region fallthrough
CT: control target
= control target key end

     0   :  { %s613_s0 = inlined_call_operand.hbm [shape: f32[8,32], index: 0, kind: input, shape index: {}]   ;;  %s614_s1 = inlined_call_operand.hbm [shape: f32[32,64], index: 1, kind: input, shape index: {}]   ;;  %s615_s2 = inlined_call_operand.vmem [shape: f32[1,64], index: 2, kind: input, shape index: {}]   ;;  %s616_s3 = inlined_call_operand.vmem [shape: f32[64,64], index: 3, kind: input, shape index: {}]   ;;  %s617_s4 = inlined_call_operand.vmem [shape: f32[1,64], index: 4, kind: input, shape index: {}]   ;;  %s618_s5 = inlined_call_operand.hbm [shape: f32[32,64], index: 5, kind: input, shape index: {}]   ;;  %s619_s6 = inlined_call_operand.vmem [shape: f32[1,64], index: 6, kind: input, shape index: {}]   ;;  %s620_s7 = inlined_call_operand.hbm [shape: f32[64,64], index: 7, kind: input, shape index: {}]   ;;  %s621_s8 = inlined_call_operand.vmem [shape: f32[1,64], index: 8, kind: input, shape index: {}]   ;;  %s622_s9 = inlined_call_operand.vmem [shape: f32[64,1], index: 9, kind: input, shape index: {}]   ;;  %s623_s10 = inlined_call_operand.<no memory space> [shape: f32[1,1], index: 10, kind: input, shape index: {}]   ;;  %s624_s11 = inlined_call_operand.vmem [shape: f32[8,1], index: 11, kind: output, shape index: {0}]   ;;  %s625_s12 = inlined_call_operand.hbm [shape: f32[8,64], index: 12, kind: output, shape index: {1}]  }
   0x1   :  { %v18_v0 = vstv %s623_s10 }
   0x2   :  { %19 = vst [vmem:[#allocation2] sm:$0x1] %v18_v0 }
   0x3   :  { %20 = vsyncpa [#allocation4], 0 }
   0x4   :  { %21 = vsyncpa [#allocation7], 0 }
   0x5   :  { %22 = vsyncpa [#allocation10], 0  ;;  %s39_s25 = sshll.u32 %s614_s1, 4  ;;  %s40_s25 = int_to_ptr.hbm [resolvable:$true] %s39_s25 }
   0x6   :  { %23 = vsyncpa [#allocation5], 0  ;;  %s454_s26 = smov [#allocation6]   ;;  %s29_s30 = sshll.u32 %s613_s0, 4  ;;  %s30_s30 = int_to_ptr.hbm [resolvable:$true] %s29_s30 }
   0x7   :  { %s41_s27 = sshll.u32 %s454_s26, 4  ;;  %s455_s13 = smov 128   ;;  %s42_s27 = int_to_ptr.vmem [resolvable:$true] %s41_s27 }
   0x8   :  { %s456_s14 = smov 8   ;;  %s457_s10 = smov [#allocation3]  }
   0x9   :  { %47 = dma.hbm_to_vmem [thread:$0]  %s40_s25, 512, %s42_s27, [#allocation7], %s455_s13, %s455_s13, %s456_s14  }
   0xa   :  { %s31_s15 = sshll.u32 %s457_s10, 4  ;;  %s58_s18 = sshll.u32 %s618_s5, 4  ;;  %s32_s15 = int_to_ptr.vmem [resolvable:$true] %s31_s15  ;;  %s59_s18 = int_to_ptr.hbm [resolvable:$true] %s58_s18 }
   0xb   :  { %34 = dma.hbm_to_vmem [thread:$0]  %s30_s30, 128, %s32_s15, [#allocation4]  }
   0xc   :  { %s73_s20 = sshll.u32 %s620_s7, 4  ;;  %s458_s21 = smov [#allocation8]   ;;  %s74_s20 = int_to_ptr.hbm [resolvable:$true] %s73_s20 }
   0xd   :  { %s60_s22 = sshll.u32 %s458_s21, 4  ;;  %s459_s0 = smov [#allocation9]   ;;  %s61_s22 = int_to_ptr.vmem [resolvable:$true] %s60_s22 }
   0xe   :  { %66 = dma.hbm_to_vmem [thread:$0]  %s59_s18, 512, %s61_s22, [#allocation7], %s455_s13, %s455_s13, %s456_s14  }
   0xf   :  { %s75_s23 = sshll.u32 %s459_s0, 4  ;;  %s76_s23 = int_to_ptr.vmem [resolvable:$true] %s75_s23 }
  0x10   :  { %81 = dma.hbm_to_vmem [thread:$0]  %s74_s20, 1024, %s76_s23, [#allocation10], %s455_s13, %s455_s13, %s456_s14  }
  0x11   :  { %446 = dma.done.wait [#allocation4], 128  }
  0x12   :  { %447 = vsyncadd [#allocation4], 4294967168 }
  0x13   :  { %448 = dma.done.wait [#allocation7], 1024  }
  0x14   :  { %449 = vsyncadd [#allocation7], 4294966272 }
  0x15   :  { %450 = dma.done.wait [#allocation10], 1024  }
  0x16   :  { %451 = vsyncadd [#allocation10], 4294966272  ;;  %v108_v1 = vld [vmem:[#allocation6 + $0x18] sm:$0xff]  ;;  %v107_v2 = vld [vmem:[#allocation6 + $0x10] sm:$0xff]  ;;  %vm113_vm0 = vcmask 261120   ;;  %vm150_vm1 = vcmask 523264  }
  0x17   :  { %129 = vmatpush.msra.mxu2 %v108_v1  ;;  %v106_v3 = vld [vmem:[#allocation6 + $0x8] sm:$0xff]  ;;  %v105_v4 = vld [vmem:[#allocation6] sm:$0xff]  ;;  %v104_v5 = vld [vmem:[#allocation3] sm:$0xff]  ;;  %s287_s19 = sshll.u32 %s625_s12, 4  ;;  %vm275_vm2 = vcmask 7168   ;;  %s288_s19 = int_to_ptr.hbm [resolvable:$true] %s287_s19 }
  0x18   :  { %v145_v6 = vld [vmem:[%s616_s3 + $0x38] sm:$0xff]  ;;  %v144_v7 = vld [vmem:[%s616_s3 + $0x30] sm:$0xff]  ;;  %v143_v8 = vld [vmem:[%s616_s3 + $0x28] sm:$0xff] }
  0x19   :  { %130 = vmatpush.msra.mxu2 %v107_v2  ;;  %162 = vmatpush.msra.mxu1 %v145_v6  ;;  %v178_v9 = vld [vmem:[#allocation8 + $0x18] sm:$0xff]  ;;  %v177_v10 = vld [vmem:[#allocation8 + $0x10] sm:$0xff]  ;;  %v176_v11 = vld [vmem:[#allocation8 + $0x8] sm:$0xff] }
  0x1a   :  { %v175_v12 = vld [vmem:[#allocation8] sm:$0xff]  ;;  %v142_v13 = vld [vmem:[%s616_s3 + $0x20] sm:$0xff]  ;;  %v141_v14 = vld [vmem:[%s616_s3 + $0x18] sm:$0xff] }
  0x1b   :  { %131 = vmatpush.msra.mxu2 %v106_v3  ;;  %163 = vmatpush.msra.mxu1 %v144_v7  ;;  %v140_v15 = vld [vmem:[%s616_s3 + $0x10] sm:$0xff]  ;;  %v139_v16 = vld [vmem:[%s616_s3 + $0x8] sm:$0xff]  ;;  %v138_v17 = vld [vmem:[%s616_s3] sm:$0xff] }
  0x1c   :  { %v211_v18 = vld [vmem:[#allocation9 + $0x38] sm:$0xff]  ;;  %v210_v19 = vld [vmem:[#allocation9 + $0x30] sm:$0xff]  ;;  %v209_v20 = vld [vmem:[#allocation9 + $0x28] sm:$0xff] }
  0x1d   :  { %132 = vmatpush.msra.mxu2 %v105_v4  ;;  %164 = vmatpush.msra.mxu1 %v143_v8  ;;  %v247_v21 = vld [vmem:[%s622_s9 + $0x38] sm:$0xff]  ;;  %v208_v22 = vld [vmem:[#allocation9 + $0x20] sm:$0xff]  ;;  %v207_v23 = vld [vmem:[#allocation9 + $0x18] sm:$0xff] }
  0x1e   :  { %301 = vmatmul.msk.f32.vlgmr.msra.gmra.mxu2 %vm113_vm0, %v104_v5  ;;  %227 = vmatpush.msra.mxu3 %v211_v18  ;;  %v206_v24 = vld [vmem:[#allocation9 + $0x10] sm:$0xff]  ;;  %v246_v25 = vld [vmem:[%s622_s9 + $0x30] sm:$0xff]  ;;  %v245_v26 = vld [vmem:[%s622_s9 + $0x28] sm:$0xff] }
  0x1f   :  { %195 = vmatpush.msrb.mxu2 %v178_v9  ;;  %165 = vmatpush.msra.mxu1 %v142_v13  ;;  %v205_v27 = vld [vmem:[#allocation9 + $0x8] sm:$0xff]  ;;  %v204_v28 = vld [vmem:[#allocation9] sm:$0xff]  ;;  %v313_v29 = vld [vmem:[%s615_s2] ss:$0 sm:$0xff] }
  0x20   :  { %228 = vmatpush.msra.mxu3 %v210_v19  ;;  %263 = vmatpush.msra.mxu0 %v247_v21  ;;  %v314_v32 = vld [vmem:[%s619_s6] ss:$0 sm:$0xff]  ;;  %v243_v38 = vld [vmem:[%s622_s9 + $0x18] sm:$0xff]  ;;  %v242_v39 = vld [vmem:[%s622_s9 + $0x10] sm:$0xff] }
  0x21   :  { %196 = vmatpush.msrb.mxu2 %v177_v10  ;;  %166 = vmatpush.msra.mxu1 %v141_v14  ;;  %v244_v37 = vld [vmem:[%s622_s9 + $0x20] sm:$0xff]  ;;  %v241_v40 = vld [vmem:[%s622_s9 + $0x8] sm:$0xff] }
  0x22   :  { %229 = vmatpush.msra.mxu3 %v209_v20  ;;  %264 = vmatpush.msra.mxu0 %v246_v25  ;;  %v240_v41 = vld [vmem:[%s622_s9] sm:$0xff]  ;;  %s460_s9 = smov [#allocation11]  }
  0x23   :  { %197 = vmatpush.msrb.mxu2 %v176_v11  ;;  %167 = vmatpush.msra.mxu1 %v140_v15  ;;  %v315_v42 = vld [vmem:[%s617_s4] ss:$0 sm:$0xff]  ;;  %s285_s17 = sshll.u32 %s460_s9, 4  ;;  %s286_s17 = int_to_ptr.vmem [resolvable:$true] %s285_s17 }
  0x24   :  { %230 = vmatpush.msra.mxu3 %v208_v22  ;;  %265 = vmatpush.msra.mxu0 %v245_v26  ;;  %v316_v46 = vld [vmem:[%s621_s8] ss:$0 sm:$0xff] }
  0x25   :  { %198 = vmatpush.msrb.mxu2 %v175_v12  ;;  %168 = vmatpush.msra.mxu1 %v139_v16  ;;  %v317_v50 = vld [vmem:[#allocation2] ss:$0 sm:$0xff] }
  0x26   :  { %303 = vmatmul.msk.f32.vlgmr.msrb.gmra.mxu2 %vm113_vm0, %v104_v5  ;;  %231 = vmatpush.msra.mxu3 %v207_v23 }
  0x27   :  { %169 = vmatpush.msra.mxu1 %v138_v17  ;;  %266 = vmatpush.msra.mxu0 %v244_v37 }
  0x28   :  { %232 = vmatpush.msra.mxu3 %v206_v24 }
  0x29   :  { %267 = vmatpush.msra.mxu0 %v243_v38 }
  0x2a   :  { %233 = vmatpush.msra.mxu3 %v205_v27 }
  0x2b   :  { %268 = vmatpush.msra.mxu0 %v242_v39 }
  0x2c   :  { %234 = vmatpush.msra.mxu3 %v204_v28 }
  0x2d   :  { %269 = vmatpush.msra.mxu0 %v241_v40 }
  0x2f   :  { %270 = vmatpush.msra.mxu0 %v240_v41 }
  0xa1   :  { %v134_v30 = vpop.f32.mrf.mxu2 }
  0xa2   :  { %v135_v31 = vadd.f32 %v313_v29, %v134_v30 }
  0xa4   :  { %318 = vtanh.f32 %v135_v31 }
  0xa9   :  { %v200_v33 = vpop.f32.mrf.mxu2 }
  0xaa   :  { %v319_v34 = vpop.eup %318  ;;  %v201_v35 = vadd.f32 %v314_v32, %v200_v33 }
  0xab   :  { %302 = vmatmul.msk.f32.vlgmr.msra.gmra.mxu1 %vm150_vm1, %v319_v34 }
  0xac   :  { %320 = vtanh.f32 %v201_v35 }
  0xb2   :  { %v321_v36 = vpop.eup %320 }
  0xb3   :  { %304 = vmatmul.msk.f32.vlgmr.msra.gmra.mxu3 %vm150_vm1, %v321_v36 }
 0x128   :  { %v171_v43 = vpop.f32.mrf.mxu1 }
 0x129   :  { %v172_v44 = vadd.f32 %v315_v42, %v171_v43 }
 0x12b   :  { %322 = vtanh.f32 %v172_v44 }
 0x131   :  { %v323_v45 = vpop.eup %322 }
 0x132   :  { %305 = vmatmul.msk.f32.vlgmr.msra.gmra.mxu0 %vm150_vm1, %v323_v45 }
 0x136   :  { %v236_v47 = vpop.f32.mrf.mxu3 }
 0x137   :  { %v237_v48 = vadd.f32 %v316_v46, %v236_v47 }
 0x139   :  { %324 = vtanh.f32 %v237_v48 }
 0x13f   :  { %v325_v49 = vpop.eup %324 }
 0x140   :  { %277 = vst.msk [vmem:[#allocation11] sm:$0xff] %vm150_vm1, %v325_v49 }
 0x141   :  { %290 = dma.vmem_to_hbm [thread:$0]  %s286_s17, 128, %s288_s19, [#allocation5]  }
 0x1af   :  { %v272_v51 = vpop.f32.mrf.mxu0 }
 0x1b0   :  { %v273_v52 = vadd.f32 %v317_v50, %v272_v51 }
 0x1b2   :  { %276 = vst.msk [vmem:[%s624_s11] sm:$0xff] %vm275_vm2, %v273_v52 }
 0x1b3   :  { %452 = dma.done.wait [#allocation5], 128  }
 0x1b4   :  { %453 = vsyncadd [#allocation5], 4294967168 }
 0x1b5   :  { %297 = vsyncpa [#allocation4], 1 }
 0x1b6   :  { %298 = vsyncpa [#allocation7], 1 }
 0x1b7   :  { %299 = vsyncpa [#allocation10], 1 }
 0x1b8   :  { %300 = vsyncpa [#allocation5], 1 }

</bundles_post_ra>
